<compile_context>
chip_gen: v7x
topology: tpu7x:2x2x1
jax: 0.10.0
libtpu: 0.0.40
codegen_flags: <defaults>
</compile_context>

<pallas_src>
import functools
import math

import jax
import jax.numpy as jnp
from jax import lax
from jax.experimental import pallas as pl
from jax.experimental.pallas import tpu as pltpu

NEG_INF = float("-inf")


# --------------------------------------------------------------------------
# pass 1: instance logits + per-class argmax feature gather
# --------------------------------------------------------------------------
def _inst_argmax_kernel(n_valid, feat_ref, wi_ref, bi_ref,
                        inst_ref, fmax_ref, mx_sc):
    i = pl.program_id(0)

    @pl.when(i == 0)
    def _init():
        mx_sc[...] = jnp.full_like(mx_sc, NEG_INF)
        fmax_ref[...] = jnp.zeros_like(fmax_ref)

    feats = feat_ref[...]                                          # (tn, D) bf16
    il = jnp.dot(feats, wi_ref[...],
                 preferred_element_type=jnp.float32) + bi_ref[...]  # (tn, C) f32
    inst_ref[...] = il

    tn, c = il.shape
    ridx = lax.broadcasted_iota(jnp.int32, (tn, c), 0)
    valid = (i * tn + ridx) < n_valid
    il_m = jnp.where(valid, il, NEG_INF)

    tmax = jnp.max(il_m, axis=0, keepdims=True)                    # (1, C)
    first = jnp.min(jnp.where(il_m == tmax, ridx, tn),
                    axis=0, keepdims=True)                         # (1, C)
    upd = tmax > mx_sc[...]                                        # (1, C) bool
    mx_sc[...] = jnp.where(upd, tmax, mx_sc[...])

    # one-hot row selector, gated by "this tile improves the running max"
    onehot = ((ridx == first) & upd).astype(feats.dtype)           # (tn, C)
    cand = lax.dot_general(onehot, feats, (((0,), (0,)), ((), ())),
                           preferred_element_type=jnp.float32)     # (C, D)
    keep_col = jnp.transpose(jnp.where(upd, 0.0, 1.0))             # (C, 1)
    fmax_ref[...] = fmax_ref[...] * keep_col + cand


# --------------------------------------------------------------------------
# pass 2: fused value/query matmul + online-softmax attention accumulation
# --------------------------------------------------------------------------
def _attention_bag_kernel(n_valid, scale, d,
                          feat_ref, wvq_ref, bvq_ref, wq2_ref, bq2_ref,
                          fmax_ref, wc_ref, bc_ref,
                          scores_ref, m_ref, linv_ref, bagfeat_ref, baglog_ref,
                          qmax_sc, l_sc):
    i = pl.program_id(0)
    n_tiles = pl.num_programs(0)

    wvq = wvq_ref[...]                                             # (D, D+H1) bf16
    bvq = bvq_ref[...]                                             # (1, D+H1) f32
    wq2 = wq2_ref[...]                                             # (H1, H2) bf16
    bq2 = bq2_ref[...]                                             # (1, H2) f32
    cdt = wvq.dtype

    @pl.when(i == 0)
    def _init():
        m_ref[...] = jnp.full_like(m_ref, NEG_INF)
        l_sc[...] = jnp.zeros_like(l_sc)
        bagfeat_ref[...] = jnp.zeros_like(bagfeat_ref)
        # query_max = query_weight(feature_max); feature_max holds exact bf16 rows
        fm = fmax_ref[...].astype(cdt)                             # (C, D)
        hm = jnp.maximum(
            jnp.dot(fm, wvq[:, d:], preferred_element_type=jnp.float32)
            + bvq[:, d:], 0.0)                                     # (C, H1)
        qmax_sc[...] = jnp.tanh(
            jnp.dot(hm.astype(cdt), wq2,
                    preferred_element_type=jnp.float32) + bq2)     # (C, H2)

    feats = feat_ref[...]                                          # (tn, D) bf16
    # fused matmul: [value_pre | h_pre] = feats @ [Wv | Wq1] + [bv | bq1]
    z = jnp.dot(feats, wvq, preferred_element_type=jnp.float32) + bvq
    value = jnp.maximum(z[:, :d], 0.0)                             # (tn, D) f32
    hq = jnp.maximum(z[:, d:], 0.0)                                # (tn, H1) f32
    query = jnp.tanh(
        jnp.dot(hq.astype(cdt), wq2, preferred_element_type=jnp.float32) + bq2)

    s = lax.dot_general(query.astype(cdt), qmax_sc[...].astype(cdt),
                        (((1,), (1,)), ((), ())),
                        preferred_element_type=jnp.float32) * scale  # (tn, C)
    tn, c = s.shape
    ridx = lax.broadcasted_iota(jnp.int32, (tn, c), 0)
    valid = (i * tn + ridx) < n_valid
    s = jnp.where(valid, s, NEG_INF)
    scores_ref[...] = s

    # online softmax over the instance axis (axis 0 across all tiles)
    m_old = m_ref[...]                                             # (1, C)
    m_new = jnp.maximum(m_old, jnp.max(s, axis=0, keepdims=True))
    alpha = jnp.exp(m_old - m_new)                                 # (1, C)
    p = jnp.exp(s - m_new)                                         # (tn, C)
    l_sc[...] = alpha * l_sc[...] + jnp.sum(p, axis=0, keepdims=True)
    m_ref[...] = m_new

    pv = lax.dot_general(p.astype(cdt), value.astype(cdt),
                         (((0,), (0,)), ((), ())),
                         preferred_element_type=jnp.float32)       # (C, D)
    bagfeat_ref[...] = bagfeat_ref[...] * jnp.transpose(alpha) + pv

    @pl.when(i == n_tiles - 1)
    def _finalize():
        # one divide per class here; per-element work elsewhere is a multiply
        inv_l = 1.0 / l_sc[...]                                    # (1, C)
        linv_ref[...] = inv_l
        bagf = bagfeat_ref[...] * jnp.transpose(inv_l)             # (C, D)
        bagfeat_ref[...] = bagf
        # classifier: Conv1d(C, C, kernel_size=D) == full (c, d) contraction
        g = jnp.sum(wc_ref[...] * bagf[None, :, :], axis=-1)       # (C, C)
        baglog_ref[...] = jnp.sum(g, axis=-1, keepdims=True) + bc_ref[...]


# --------------------------------------------------------------------------
# pass 3: normalize streamed scores into the attention output
# --------------------------------------------------------------------------
def _attn_normalize_kernel(scores_ref, m_ref, linv_ref, attn_ref):
    attn_ref[...] = jnp.exp(scores_ref[...] - m_ref[...]) * linv_ref[...]


# --------------------------------------------------------------------------
# wrapper
# --------------------------------------------------------------------------
def dsmil_forward(features, params, *, tile_n=128, mxu_dtype=jnp.bfloat16):
    n, d = features.shape
    c = params["Wi"].shape[1]
    h1 = params["Wq1"].shape[1]
    h2 = params["Wq2"].shape[1]
    assert tile_n % 8 == 0

    n_tiles = (n + tile_n - 1) // tile_n
    n_pad = n_tiles * tile_n

    feats = features.astype(mxu_dtype)
    if n_pad != n:
        feats = jnp.pad(feats, ((0, n_pad - n), (0, 0)))

    f32 = jnp.float32
    wi = params["Wi"].astype(mxu_dtype)
    bi = params["bi"].astype(f32)
    wvq = jnp.concatenate([params["Wv"], params["Wq1"]], axis=1).astype(mxu_dtype)
    bvq = jnp.concatenate([params["bv"], params["bq1"]], axis=1).astype(f32)
    wq2 = params["Wq2"].astype(mxu_dtype)
    bq2 = params["bq2"].astype(f32)
    wc = params["Wc"].astype(f32)                                  # (C, C, D)
    bc = params["bc"].astype(f32)                                  # (C, 1)

    vmem_cap = 32 * 1024 * 1024
    seq_params = pltpu.CompilerParams(
        dimension_semantics=("arbitrary",), vmem_limit_bytes=vmem_cap)
    par_params = pltpu.CompilerParams(
        dimension_semantics=("parallel",), vmem_limit_bytes=vmem_cap)

    const = lambda i: (0, 0)
    const3 = lambda i: (0, 0, 0)
    tiled_feat = pl.BlockSpec((tile_n, d), lambda i: (i, 0))
    tiled_c = pl.BlockSpec((tile_n, c), lambda i: (i, 0))

    # ---- pass 1 ----
    inst_logits, feature_max = pl.pallas_call(
        functools.partial(_inst_argmax_kernel, n),
        grid=(n_tiles,),
        in_specs=[
            tiled_feat,
            pl.BlockSpec((d, c), const),
            pl.BlockSpec((1, c), const),
        ],
        out_specs=(
            tiled_c,
            pl.BlockSpec((c, d), const),
        ),
        out_shape=(
            jax.ShapeDtypeStruct((n_pad, c), f32),
            jax.ShapeDtypeStruct((c, d), f32),
        ),
        scratch_shapes=[pltpu.VMEM((1, c), f32)],
        compiler_params=seq_params,
    )(feats, wi, bi)

    # ---- pass 2 ----
    scale = 1.0 / math.sqrt(float(h2))
    scores, m_row, linv_row, bag_feature, bag_logits = pl.pallas_call(
        functools.partial(_attention_bag_kernel, n, scale, d),
        grid=(n_tiles,),
        in_specs=[
            tiled_feat,
            pl.BlockSpec((d, d + h1), const),
            pl.BlockSpec((1, d + h1), const),
            pl.BlockSpec((h1, h2), const),
            pl.BlockSpec((1, h2), const),
            pl.BlockSpec((c, d), const),
            pl.BlockSpec((c, c, d), const3),
            pl.BlockSpec((c, 1), const),
        ],
        out_specs=(
            tiled_c,
            pl.BlockSpec((1, c), const),
            pl.BlockSpec((1, c), const),
            pl.BlockSpec((c, d), const),
            pl.BlockSpec((c, 1), const),
        ),
        out_shape=(
            jax.ShapeDtypeStruct((n_pad, c), f32),
            jax.ShapeDtypeStruct((1, c), f32),
            jax.ShapeDtypeStruct((1, c), f32),
            jax.ShapeDtypeStruct((c, d), f32),
            jax.ShapeDtypeStruct((c, 1), f32),
        ),
        scratch_shapes=[
            pltpu.VMEM((c, h2), f32),
            pltpu.VMEM((1, c), f32),
        ],
        compiler_params=seq_params,
    )(feats, wvq, bvq, wq2, bq2, feature_max, wc, bc)

    # ---- pass 3 ----
    attn = pl.pallas_call(
        _attn_normalize_kernel,
        grid=(n_tiles,),
        in_specs=[
            tiled_c,
            pl.BlockSpec((1, c), const),
            pl.BlockSpec((1, c), const),
        ],
        out_specs=tiled_c,
        out_shape=jax.ShapeDtypeStruct((n_pad, c), f32),
        compiler_params=par_params,
    )(scores, m_row, linv_row)

    return (bag_logits[:, 0], inst_logits[:n], attn[:n], bag_feature)


# --------------------------------------------------------------------------
# pure-JAX reference (mirrors the PyTorch eval forward with the same
# bf16-operand / f32-accumulate matmul policy as the kernel)
# --------------------------------------------------------------------------
def dsmil_reference(features, p, mxu_dtype=jnp.bfloat16):
    f32 = jnp.float32
    hi = lax.Precision.HIGHEST
    f = features.astype(mxu_dtype)
    wi = p["Wi"].astype(mxu_dtype)
    wv = p["Wv"].astype(mxu_dtype)
    wq1 = p["Wq1"].astype(mxu_dtype)
    wq2 = p["Wq2"].astype(mxu_dtype)

    inst = jnp.dot(f, wi, preferred_element_type=f32) + p["bi"]
    value = jnp.maximum(jnp.dot(f, wv, preferred_element_type=f32) + p["bv"], 0.0)

    def qw(x):
        h = jnp.maximum(jnp.dot(x, wq1, preferred_element_type=f32) + p["bq1"], 0.0)
        return jnp.tanh(
            jnp.dot(h.astype(mxu_dtype), wq2, preferred_element_type=f32) + p["bq2"])

    query = qw(f)
    idx = jnp.argmax(inst, axis=0)                  # torch.sort desc, row 0
    feature_max = f[idx]
    query_max = qw(feature_max)
    scores = jnp.dot(query.astype(mxu_dtype), query_max.astype(mxu_dtype).T,
                     preferred_element_type=f32) / jnp.sqrt(f32(query.shape[1]))
    attn = jax.nn.softmax(scores, axis=0)
    bag_feature = jnp.dot(attn.T.astype(mxu_dtype), value.astype(mxu_dtype),
                          preferred_element_type=f32)
    bag_logits = jnp.einsum("ocd,cd->o", p["Wc"], bag_feature,
                            precision=hi) + p["bc"][:, 0]
    return bag_logits, inst, attn, bag_feature


def init_params(key, num_classes, size):
    d, h1, h2 = size
    ks = jax.random.split(key, 6)

    def lin(k, fan_in, fan_out):
        scale = 1.0 / jnp.sqrt(jnp.float32(fan_in))
        kw, kb = jax.random.split(k)
        w = jax.random.uniform(kw, (fan_in, fan_out), jnp.float32, -scale, scale)
        b = jax.random.uniform(kb, (1, fan_out), jnp.float32, -scale, scale)
        return w, b

    Wi, bi = lin(ks[0], d, num_classes)
    Wq1, bq1 = lin(ks[1], d, h1)
    Wq2, bq2 = lin(ks[2], h1, h2)
    Wv, bv = lin(ks[3], d, d)
    cscale = 1.0 / jnp.sqrt(jnp.float32(num_classes * d))
    Wc = jax.random.uniform(ks[4], (num_classes, num_classes, d), jnp.float32,
                            -cscale, cscale)
    bc = jax.random.uniform(ks[5], (num_classes, 1), jnp.float32, -cscale, cscale)
    return dict(Wi=Wi, bi=bi, Wq1=Wq1, bq1=bq1, Wq2=Wq2, bq2=bq2,
                Wv=Wv, bv=bv, Wc=Wc, bc=bc)


if __name__ == "__main__":
    # Small shapes consistent with the module defaults (size=[768,128,128]):
    # N instances of dim D, C classes; N deliberately not a tile multiple.
    N, D, H1, H2, C = 500, 256, 128, 128, 4
    key = jax.random.PRNGKey(0)
    kf, kp = jax.random.split(key)
    features = jax.random.normal(kf, (N, D), jnp.float32)
    params = init_params(kp, C, [D, H1, H2])

    outs = dsmil_forward(features, params, tile_n=128)
    outs = jax.block_until_ready(outs)
    bag_logits, inst_logits, attn, bag_feature = outs

    ref = dsmil_reference(features, params)
    names = ["bag_logits", "inst_logits", "attn", "bag_feature"]
    for name, a, b in zip(names, outs, ref):
        assert a.shape == b.shape, (name, a.shape, b.shape)
        err = float(jnp.max(jnp.abs(a - b)))
        assert jnp.allclose(a, b, rtol=2e-3, atol=2e-3), (name, err)

    print("KERNEL_OK")
</pallas_src>

<mosaic_0001>
module attributes {stable_mosaic.version = 11 : i64} {
  func.func @_inst_argmax_kernel(%arg0: i32, %arg1: memref<128x256xbf16, #tpu.memory_space<vmem>>, %arg2: memref<256x4xbf16, #tpu.memory_space<vmem>>, %arg3: memref<1x4xf32, #tpu.memory_space<vmem>>, %arg4: memref<128x4xf32, #tpu.memory_space<vmem>>, %arg5: memref<4x256xf32, #tpu.memory_space<vmem>>, %arg6: memref<1x4xf32, #tpu.memory_space<vmem>>) attributes {dimension_semantics = [#tpu.dimension_semantics<arbitrary>], iteration_bounds = array<i64: 4>, scalar_prefetch = 0 : i64, scratch_operands = 1 : i64, tpu.core_type = #tpu.core_type<tc>, window_params = [{transform_indices = @transform_0, window_bounds = array<i64: 128, 256>}, {pipeline_mode = #tpu.pipeline_mode<synchronous>, transform_indices = @transform_1, window_bounds = array<i64: 256, 4>}, {pipeline_mode = #tpu.pipeline_mode<synchronous>, transform_indices = @transform_2, window_bounds = array<i64: 1, 4>}, {transform_indices = @transform_3, window_bounds = array<i64: 128, 4>}, {pipeline_mode = #tpu.pipeline_mode<synchronous>, transform_indices = @transform_4, window_bounds = array<i64: 4, 256>}]} {
    %c0_i32 = arith.constant 0 : i32
    %0 = arith.cmpi eq, %arg0, %c0_i32 : i32
    %1 = arith.extui %0 : i1 to i32
    %c0_i32_0 = arith.constant 0 : i32
    %2 = arith.cmpi ne, %1, %c0_i32_0 : i32
    scf.if %2 {
      %cst_25 = arith.constant 0xFF800000 : f32
      %48 = vector.broadcast %cst_25 : f32 to vector<1x4xf32>
      %c0_26 = arith.constant 0 : index
      %c0_27 = arith.constant 0 : index
      %49 = vector.load %arg6[%c0_26, %c0_27] : memref<1x4xf32, #tpu.memory_space<vmem>>, vector<1x4xf32>
      tpu.vector_store %arg6[%c0_26, %c0_27], %48 {strides = array<i32>} : memref<1x4xf32, #tpu.memory_space<vmem>>, vector<1x4xf32>,
      %cst_28 = arith.constant 0.000000e+00 : f32
      %50 = vector.broadcast %cst_28 : f32 to vector<4x256xf32>
      %c0_29 = arith.constant 0 : index
      %c0_30 = arith.constant 0 : index
      %51 = vector.load %arg5[%c0_29, %c0_30] : memref<4x256xf32, #tpu.memory_space<vmem>>, vector<4x256xf32>
      tpu.vector_store %arg5[%c0_29, %c0_30], %50 {strides = array<i32>} : memref<4x256xf32, #tpu.memory_space<vmem>>, vector<4x256xf32>,
    } else {
    }
    %c0 = arith.constant 0 : index
    %c0_1 = arith.constant 0 : index
    %3 = vector.load %arg1[%c0, %c0_1] : memref<128x256xbf16, #tpu.memory_space<vmem>>, vector<128x256xbf16>
    %c0_2 = arith.constant 0 : index
    %c0_3 = arith.constant 0 : index
    %4 = vector.load %arg2[%c0_2, %c0_3] : memref<256x4xbf16, #tpu.memory_space<vmem>>, vector<256x4xbf16>
    %cst = arith.constant dense<0.000000e+00> : vector<128x4xf32>
    %5 = tpu.matmul %3, %4, %cst {dimension_numbers = #tpu.dot_dimension_numbers<[1], [0], [0], [1], [0, 0, 1, 1], [], []>} : vector<128x256xbf16>, vector<256x4xbf16>, vector<128x4xf32> -> vector<128x4xf32>
    %c0_4 = arith.constant 0 : index
    %c0_5 = arith.constant 0 : index
    %6 = vector.load %arg3[%c0_4, %c0_5] : memref<1x4xf32, #tpu.memory_space<vmem>>, vector<1x4xf32>
    %7 = vector.broadcast %6 : vector<1x4xf32> to vector<128x4xf32>
    %8 = arith.addf %5, %7 : vector<128x4xf32>
    %c0_6 = arith.constant 0 : index
    %c0_7 = arith.constant 0 : index
    %9 = vector.load %arg4[%c0_6, %c0_7] : memref<128x4xf32, #tpu.memory_space<vmem>>, vector<128x4xf32>
    tpu.vector_store %arg4[%c0_6, %c0_7], %8 {strides = array<i32>} : memref<128x4xf32, #tpu.memory_space<vmem>>, vector<128x4xf32>,
    %10 = tpu.iota {dimensions = array<i32: 0>} : vector<128x4xi32>
    %c128_i32 = arith.constant 128 : i32
    %11 = arith.muli %arg0, %c128_i32 : i32
    %12 = vector.broadcast %11 : i32 to vector<128x4xi32>
    %13 = arith.addi %12, %10 : vector<128x4xi32>
    %c500_i32 = arith.constant 500 : i32
    %14 = vector.broadcast %c500_i32 : i32 to vector<128x4xi32>
    %15 = arith.cmpi slt, %13, %14 : vector<128x4xi32>
    %cst_8 = arith.constant 0xFF800000 : f32
    %16 = vector.broadcast %cst_8 : f32 to vector<128x4xf32>
    %17 = arith.select %15, %8, %16 : vector<128x4xi1>, vector<128x4xf32>
    %cst_9 = arith.constant dense<0xFF800000> : vector<4xf32>
    %18 = vector.multi_reduction <maximumf>, %17, %cst_9 [0] : vector<128x4xf32> to vector<4xf32>
    %19 = vector.shape_cast %18 : vector<4xf32> to vector<1x4xf32>
    %20 = vector.broadcast %19 : vector<1x4xf32> to vector<128x4xf32>
    %21 = arith.cmpf oeq, %17, %20 : vector<128x4xf32>
    %c128_i32_10 = arith.constant 128 : i32
    %22 = vector.broadcast %c128_i32_10 : i32 to vector<128x4xi32>
    %23 = arith.select %21, %10, %22 : vector<128x4xi1>, vector<128x4xi32>
    %cst_11 = arith.constant dense<2147483647> : vector<4xi32>
    %24 = vector.multi_reduction <minsi>, %23, %cst_11 [0] : vector<128x4xi32> to vector<4xi32>
    %25 = vector.shape_cast %24 : vector<4xi32> to vector<1x4xi32>
    %c0_12 = arith.constant 0 : index
    %c0_13 = arith.constant 0 : index
    %26 = vector.load %arg6[%c0_12, %c0_13] : memref<1x4xf32, #tpu.memory_space<vmem>>, vector<1x4xf32>
    %27 = arith.cmpf ogt, %19, %26 : vector<1x4xf32>
    %c0_14 = arith.constant 0 : index
    %c0_15 = arith.constant 0 : index
    %28 = vector.load %arg6[%c0_14, %c0_15] : memref<1x4xf32, #tpu.memory_space<vmem>>, vector<1x4xf32>
    %29 = arith.select %27, %19, %28 : vector<1x4xi1>, vector<1x4xf32>
    %c0_16 = arith.constant 0 : index
    %c0_17 = arith.constant 0 : index
    %30 = vector.load %arg6[%c0_16, %c0_17] : memref<1x4xf32, #tpu.memory_space<vmem>>, vector<1x4xf32>
    tpu.vector_store %arg6[%c0_16, %c0_17], %29 {strides = array<i32>} : memref<1x4xf32, #tpu.memory_space<vmem>>, vector<1x4xf32>,
    %31 = vector.broadcast %25 : vector<1x4xi32> to vector<128x4xi32>
    %32 = arith.cmpi eq, %10, %31 : vector<128x4xi32>
    %33 = vector.broadcast %27 : vector<1x4xi1> to vector<128x4xi1>
    %34 = arith.andi %32, %33 : vector<128x4xi1>
    %35 = arith.extui %34 : vector<128x4xi1> to vector<128x4xi32>
    %36 = arith.sitofp %35 : vector<128x4xi32> to vector<128x4xf32>
    %37 = arith.truncf %36 : vector<128x4xf32> to vector<128x4xbf16>
    %cst_18 = arith.constant dense<0.000000e+00> : vector<4x256xf32>
    %38 = tpu.matmul %37, %3, %cst_18 {dimension_numbers = #tpu.dot_dimension_numbers<[0], [0], [1], [1], [0, 1, 1, 1], [], []>} : vector<128x4xbf16>, vector<128x256xbf16>, vector<4x256xf32> -> vector<4x256xf32>
    %cst_19 = arith.constant 0.000000e+00 : f32
    %cst_20 = arith.constant 1.000000e+00 : f32
    %39 = vector.broadcast %cst_19 : f32 to vector<1x4xf32>
    %40 = vector.broadcast %cst_20 : f32 to vector<1x4xf32>
    %41 = arith.select %27, %39, %40 : vector<1x4xi1>, vector<1x4xf32>
    %42 = tpu.transpose %41, [1, 0] : vector<1x4xf32> -> vector<4x1xf32>
    %c0_21 = arith.constant 0 : index
    %c0_22 = arith.constant 0 : index
    %43 = vector.load %arg5[%c0_21, %c0_22] : memref<4x256xf32, #tpu.memory_space<vmem>>, vector<4x256xf32>
    %44 = vector.broadcast %42 : vector<4x1xf32> to vector<4x256xf32>
    %45 = arith.mulf %43, %44 : vector<4x256xf32>
    %46 = arith.addf %45, %38 : vector<4x256xf32>
    %c0_23 = arith.constant 0 : index
    %c0_24 = arith.constant 0 : index
    %47 = vector.load %arg5[%c0_23, %c0_24] : memref<4x256xf32, #tpu.memory_space<vmem>>, vector<4x256xf32>
    tpu.vector_store %arg5[%c0_23, %c0_24], %46 {strides = array<i32>} : memref<4x256xf32, #tpu.memory_space<vmem>>, vector<4x256xf32>,
    return
  }
  func.func @transform_0(%arg0: i32) -> (i32, i32) {
    %c0_i32 = arith.constant 0 : i32
    %c0_i32_0 = arith.constant 0 : i32
    return %arg0, %c0_i32 : i32, i32
  }
  func.func @transform_1(%arg0: i32) -> (i32, i32) {
    %c0_i32 = arith.constant 0 : i32
    %c0_i32_0 = arith.constant 0 : i32
    %c0_i32_1 = arith.constant 0 : i32
    return %c0_i32, %c0_i32_0 : i32, i32
  }
  func.func @transform_2(%arg0: i32) -> (i32, i32) {
    %c0_i32 = arith.constant 0 : i32
    %c0_i32_0 = arith.constant 0 : i32
    %c0_i32_1 = arith.constant 0 : i32
    return %c0_i32, %c0_i32_0 : i32, i32
  }
  func.func @transform_3(%arg0: i32) -> (i32, i32) {
    %c0_i32 = arith.constant 0 : i32
    %c0_i32_0 = arith.constant 0 : i32
    return %arg0, %c0_i32 : i32, i32
  }
  func.func @transform_4(%arg0: i32) -> (i32, i32) {
    %c0_i32 = arith.constant 0 : i32
    %c0_i32_0 = arith.constant 0 : i32
    %c0_i32_1 = arith.constant 0 : i32
    return %c0_i32, %c0_i32_0 : i32, i32
  }
}

</mosaic_0001>

<bundles_post_ra>
// kernel: tpu_custom_call.1
= control target key start
LH: loop header
LB: loop body
LE: loop exit
PB: predicated region body
PF: predicated region fallthrough
CT: control target
= control target key end

     0   :  { %10 = vsyncpa [#allocation4], 0  ;;  %s1966_s0 = inlined_call_operand.hbm [shape: bf16[512,256], index: 0, kind: input, shape index: {}]   ;;  %s1967_s1 = inlined_call_operand.vmem [shape: bf16[256,4], index: 1, kind: input, shape index: {}]   ;;  %s1968_s2 = inlined_call_operand.vmem [shape: f32[1,4], index: 2, kind: input, shape index: {}]   ;;  %s1969_s3 = inlined_call_operand.vmem [shape: f32[512,4], index: 3, kind: output, shape index: {0}]   ;;  %s1970_s4 = inlined_call_operand.hbm [shape: f32[4,256], index: 4, kind: output, shape index: {1}]  }
   0x1   :  { %12 = vsyncpa [#allocation4 + $0x1], 0 }
   0x2   :  { %13 = vsyncpa [#allocation5], 0  ;;  %s1408_s15 = smov 0   ;;  %s1410_s16 = smov 0  }
   0x3   :  { %s1412_s17 = smov 0   ;;  %s1414_s18 = smov 0  }
   0x4 LB: > { %s1427_s19 = sadd.s32 4294967295, %s1371_s18   ;;  %s1430_s20 = sadd.s32 1, %s1371_s18   ;;  %s1371_s18 = sphi %s1414_s18, %s1995_s18   ;;  %s1367_s17 = sphi %s1412_s17, %s1994_s17   ;;  %s1363_s16 = sphi %s1410_s16, %s1993_s16   ;;  %s1359_s15 = sphi %s1408_s15, %s1992_s15  }
   0x5   : > { %s23_s21 = ssub.s32 %s1371_s18, %s1430_s20  ;;  %s26_s22 = sadd.s32 1, %s1367_s17 }
   0x6   : > { %p24_p0 = scmp.eq.s32.totalorder %s23_s21, 0  ;;  %p33_p1 = scmp.ne.s32.totalorder %s1367_s17, %s1363_s16 }
   0x7   : > { %p34_p2 = scmp.eq.s32.totalorder %s1371_s18, 0  ;;  %p39_p3 = scmp.ne.s32.totalorder %s1363_s16, %s1359_s15 }
   0x8   : > { %s1440_s23 = scalar_select %p24_p0, %s1367_s17, %s26_s22  }
   0x9   : > { %p35_p4 = por %p34_p2, %p33_p1  ;;  %p40_p5 = scmp.eq.s32.totalorder %s1427_s19, 0 }
   0xa   : > { %p1191_p6 = scmp.lt.s32.totalorder %s1371_s18, 4  ;;  %s158_s25 = sand.u32 1, %s1367_s17  }
   0xb   : > { %p1444_p7 = por %p40_p5, %p39_p3  ;;  %s1052_s26 = sshll.u32 %s158_s25, 7 }
   0xc   : > { %s1116_s27 = sshll.u32 %s1371_s18, 11  ;;  %s162_s5 = scalar_lea.vmem [#allocation3], %s1052_s26 }
   0xd   : > { %s1453_s30 = scalar_lea.hbm %s1966_s0, %s1116_s27  ;;  %s170_s6 = sshll.u32 %s162_s5, 4  ;;  %s1455_s6 = int_to_ptr.vmem [resolvable:$true] %s170_s6 }
   0xe   : > { %p1457_p8 = pnand %p1191_p6, %p35_p4  ;;  %s1462_s8 = scalar_lea.sflag [#allocation4], %s158_s25 }
   0xf   : > { %s1277_s9 = scalar_lea.hbm %s1453_s30, 2048  ;;  %s1282_s12 = scalar_lea.hbm %s1966_s0, 8192 }
  0x10   : > { %p1278_p10 = scmp.ne.s32.totalorder %s1453_s30, %s1277_s9  ;;  %p1279_p11 = pneg %p1457_p8 }
  0x11   : > { %p1283_p0 = scmp.lt.u32.totalorder %s1453_s30, %s1966_s0  ;;  %p1284_p1 = scmp.lt.u32.totalorder %s1282_s12, %s1277_s9 }
  0x12   : > { %p1280_p12 = pnand %p1279_p11, %p1278_p10  ;;  %p1286_p3 = scmp.lt.u32.totalorder %s1277_s9, %s1453_s30 }
  0x13   : > { %p1285_p2 = por %p1284_p1, %p1283_p0 }
  0x14   : > { %p1281_p13 = pneg %p1280_p12 }
  0x15   : > { %p1287_p4 = por %p1286_p3, %p1285_p2 }
  0x17   : > { %p1288_p5 = pnand %p1287_p4, %p1281_p13 }
  0x19   : > { %1291 = shalt.err (!%p1288_p5)
}
  0x1a   : > { %s1292_s15 = scalar_lea.vmem %s1455_s6, 2048  ;;  %s1373_s21 = smov [#allocation3]  }
  0x1b   : > { %p1293_p6 = scmp.ne.s32.totalorder %s1455_s6, %s1292_s15  ;;  %s1297_s22 = sshll.u32 %s1373_s21, 4  ;;  %s1298_s22 = int_to_ptr.vmem [resolvable:$false] %s1297_s22 }
  0x1c   : > { %s1299_s25 = scalar_lea.vmem %s1298_s22, 4096  ;;  %p1300_p9 = scmp.lt.s32.totalorder %s1455_s6, %s1298_s22 }
  0x1d   : > { %p1295_p10 = pnand %p1293_p6, %p1279_p11  ;;  %p1301_p0 = scmp.lt.s32.totalorder %s1299_s25, %s1292_s15 }
  0x1f   : > { %p1296_p12 = pneg %p1295_p10  ;;  %p1302_p1 = por %p1301_p0, %p1300_p9 }
  0x21   : > { %p1303_p2 = pnand %p1302_p1, %p1296_p12 }
  0x23   : > { %1306 = shalt.err (!%p1303_p2)
}
  0x24   : > { %s1374_s26 = smov 128   ;;  %s1375_s27 = smov 8  }
  0x25   : > { %1190 = dma.hbm_to_vmem [thread:$0]  (!%p1457_p8), %s1453_s30, 2048, %s1455_s6, %s1462_s8, %s1374_s26, %s1374_s26, %s1375_s27  }
  0x26   : > { %p178_p11 = scmp.lt.s32.totalorder %s1371_s18, 5  ;;  %p1974_p13 = scmp.ge.s32.totalorder %s1371_s18, 1 }
  0x28   : > { %p179_p3 = pnand %p1974_p13, %p178_p11 }
  0x29   : > { %s184_s28 = sand.u32 (!%p179_p3), 1, %s1363_s16  }
  0x2a   : > { %182 = sbr.rel (%p179_p3) target bundleno = 771 (0x303), region = 32  ;;  %s1057_s29 = sshll.u32 (!%p179_p3), %s184_s28, 7 }
  0x2b   : > { %s185_s5 = scalar_lea.sflag (!%p179_p3), [#allocation4], %s184_s28  ;;  %s1494_s9 = scalar_lea.vmem (!%p179_p3), [#allocation3], %s1057_s29 }
  0x31   : > { %1350 = dma.done.wait (%p1444_p7), %s185_s5, 2048  }
  0x32   : > { %1352 = vsyncadd (%p1444_p7), %s185_s5, 4294965248  ;;  %s1058_s10 = sshll.u32 %s1427_s19, 4  ;;  %p1060_p8 = scmp.ne.s32.totalorder %s1427_s19, 0 }
  0x33   : > { %p215_p9 = scmp.lt.s32.totalorder %s1058_s10, 63  ;;  %vm225_vm0 = vcmask (!%p1060_p8), 24576   ;;  %v1376_v0 = vmov (!%p1060_p8), -inf   ;;  %v1377_v1 = vmov (!%p1060_p8), 0.0  }
  0x34   : > { %224 = sbr.rel (%p1060_p8) target bundleno = 59 (0x3b), region = 40  ;;  %226 = vst.msk [vmem:[#allocation2] sm:$0x1] (!%p1060_p8), %vm225_vm0, %v1376_v0  ;;  %227 = vst [vmem:[#allocation6] sm:$0xff] (!%p1060_p8), %v1377_v1 }
  0x35   : > { %s1997_s10 = smov (!%p215_p9, %s1058_s10), 63 }
  0x36   : > { %s1059_s30 = sshll.u32 %s1997_s10, 3 }
  0x37   : > { %s1504_s7 = scalar_lea.vmem %s1969_s3, %s1059_s30 }
  0x3b PF: > { %v1237_v2 = vld [vmem:[%s1967_s1 + $0x40] sm:$0xff]   ;;  %v1239_v4 = vld [vmem:[%s1967_s1 + $0x48] sm:$0xff]   ;;  %v1241_v6 = vld [vmem:[%s1967_s1 + $0x50] sm:$0xff]   ;;  %v1378_v34 = vmov 0   ;;  %vm1971_vm1 = vcmask 31744   ;;  %v573_v40 = vlaneseq  ;;  %s1094_s5 = sshll.u32 %s1427_s19, 7 }
  0x3c   : > { %v1238_v3 = vld [vmem:[%s1967_s1] sm:$0xff]   ;;  %1117 = vmatprep.subr.bf16.mxu0 %v1237_v2  ;;  %v1240_v5 = vld [vmem:[%s1967_s1 + $0x8] sm:$0xff]   ;;  %v1242_v7 = vld [vmem:[%s1967_s1 + $0x10] sm:$0xff]   ;;  %895 = vmatprep.mubr.bf16.mxu1 %v1378_v34  ;;  %v1586_v48 = vstv %s1094_s5  ;;  %p1192_p7 = scmp.eq.s32.totalorder %s1427_s19, 3 }
  0x3d   : > { %1118 = vmatpush3.bf16.msra.mxu0 %v1238_v3  ;;  %v1243_v8 = vld [vmem:[%s1967_s1 + $0x58] sm:$0xff]   ;;  %v1245_v10 = vld [vmem:[%s1967_s1 + $0x60] sm:$0xff]   ;;  %v1247_v12 = vld [vmem:[%s1967_s1 + $0x68] sm:$0xff]   ;;  %v1581_v45 = vshrl.u32 %v573_v40, 7 }
  0x3e   : > { %1119 = vmatprep.subr.bf16.mxu0 %v1239_v4  ;;  %v1244_v9 = vld [vmem:[%s1967_s1 + $0x18] sm:$0xff]   ;;  %v1246_v11 = vld [vmem:[%s1967_s1 + $0x20] sm:$0xff]   ;;  %v1248_v14 = vld [vmem:[%s1967_s1 + $0x28] sm:$0xff]  }
  0x3f   : > { %v1255_v13 = vld [vmem:[%s1494_s9 + $0x4] ss:$8 sps:$4 sm:$0xff]   ;;  %v1253_v16 = vld [vmem:[%s1494_s9] ss:$8 sps:$4 sm:$0xff]   ;;  %v1256_v17 = vld [vmem:[%s1494_s9 + $0x14] ss:$8 sps:$4 sm:$0xff]   ;;  %v592_v56 = vadd.s32 %v1586_v48, %v1581_v45 }
  0x40   : > { %v1249_v15 = vld [vmem:[%s1967_s1 + $0x70] sm:$0xff]   ;;  %491 = vmatprep.mubr.bf16.mxu0 %v1255_v13  ;;  %863 = vmatprep.subr.bf16.mxu1 %v1255_v13  ;;  %v1251_v19 = vld [vmem:[%s1967_s1 + $0x78] sm:$0xff]   ;;  %v1261_v23 = vld [vmem:[%s1494_s9 + $0x20] ss:$8 sps:$4 sm:$0xff]   ;;  %v1589_v51 = vadd.s32 8, %v1581_v45  ;;  %v1592_v53 = vadd.s32 32, %v1581_v45 }
  0x41   : > { %1120 = vmatpush3.bf16.msra.mxu0 %v1240_v5  ;;  %864 = vmatpush1.bf16.msra.mxu1 %v1253_v16  ;;  %v1250_v18 = vld [vmem:[%s1967_s1 + $0x30] sm:$0xff]   ;;  %v1252_v22 = vld [vmem:[%s1967_s1 + $0x38] sm:$0xff]   ;;  %v1267_v27 = vld [vmem:[%s1494_s9 + $0x40] ss:$8 sps:$4 sm:$0xff]   ;;  %v1598_v57 = vadd.s32 40, %v1581_v45  ;;  %vm608_vm2 = vcmp.lt.s32.totalorder %v592_v56, 500 }
  0x42   : > { %1121 = vmatprep.subr.bf16.mxu0 %v1241_v6  ;;  %865 = vmatprep.subr.bf16.mxu1 %v1256_v17  ;;  %v1258_v20 = vld [vmem:[%s1494_s9 + $0x10] ss:$8 sps:$4 sm:$0xff]   ;;  %v1259_v21 = vld [vmem:[%s1494_s9 + $0x24] ss:$8 sps:$4 sm:$0xff]   ;;  %v1262_v24 = vld [vmem:[%s1494_s9 + $0x34] ss:$8 sps:$4 sm:$0xff]   ;;  %v593_v59 = vadd.s32 %v1586_v48, %v1589_v51  ;;  %v596_v60 = vadd.s32 %v1586_v48, %v1592_v53 }
  0x43   : > { %v1264_v25 = vld [vmem:[%s1494_s9 + $0x30] ss:$8 sps:$4 sm:$0xff]   ;;  %v1265_v26 = vld [vmem:[%s1494_s9 + $0x44] ss:$8 sps:$4 sm:$0xff]   ;;  %v1268_v28 = vld [vmem:[%s1494_s9 + $0x54] ss:$8 sps:$4 sm:$0xff]   ;;  %v597_v0 = vadd.s32 %v1586_v48, %v1598_v57 }
  0x44   : > { %v1270_v29 = vld [vmem:[%s1494_s9 + $0x50] ss:$8 sps:$4 sm:$0xff]   ;;  %v1271_v30 = vld [vmem:[%s1494_s9 + $0x64] ss:$8 sps:$4 sm:$0xff]   ;;  %v1273_v31 = vld [vmem:[%s1494_s9 + $0x60] ss:$8 sps:$4 sm:$0xff]  }
  0x45   : > { %1122 = vmatpush3.bf16.msra.mxu0 %v1242_v7  ;;  %866 = vmatpush1.bf16.msra.mxu1 %v1258_v20  ;;  %v1274_v32 = vld [vmem:[%s1494_s9 + $0x74] ss:$8 sps:$4 sm:$0xff]   ;;  %v1276_v33 = vld [vmem:[%s1494_s9 + $0x70] ss:$8 sps:$4 sm:$0xff]   ;;  %v1610_v62 = vadd.s32 16, %v1581_v45  ;;  %vm609_vm3 = vcmp.lt.s32.totalorder %v593_v59, 500 }
  0x46   : > { %1123 = vmatprep.subr.bf16.mxu0 %v1243_v8  ;;  %867 = vmatprep.subr.bf16.mxu1 %v1259_v21  ;;  %v1575_v36 = vld [vmem:[%s1968_s2] ss:$0 sm:$0xff]  ;;  %v1615_v3 = vadd.s32 24, %v1581_v45  ;;  %vm612_vm4 = vcmp.lt.s32.totalorder %v596_v60, 500  ;;  %v1618_v5 = vadd.s32 48, %v1581_v45  ;;  %vm613_vm5 = vcmp.lt.s32.totalorder %v597_v0, 500 }
  0x49   : > { %1124 = vmatpush3.bf16.msra.mxu0 %v1244_v9  ;;  %868 = vmatpush1.bf16.msra.mxu1 %v1261_v23  ;;  %v594_v9 = vadd.s32 %v1586_v48, %v1610_v62 }
  0x4a   : > { %1125 = vmatprep.subr.bf16.mxu0 %v1245_v10  ;;  %869 = vmatprep.subr.bf16.mxu1 %v1262_v24  ;;  %v1626_v10 = vadd.s32 56, %v1581_v45 }
  0x4b   : > { %vm610_vm6 = vcmp.lt.s32.totalorder %v594_v9, 500 }
  0x4d   : > { %1126 = vmatpush3.bf16.msra.mxu0 %v1246_v11  ;;  %870 = vmatpush1.bf16.msra.mxu1 %v1264_v25 }
  0x4e   : > { %1127 = vmatprep.subr.bf16.mxu0 %v1247_v12  ;;  %871 = vmatprep.subr.bf16.mxu1 %v1265_v26 }
  0x51   : > { %1128 = vmatpush3.bf16.msra.mxu0 %v1248_v14  ;;  %872 = vmatpush1.bf16.msra.mxu1 %v1267_v27 }
  0x52   : > { %1129 = vmatprep.subr.bf16.mxu0 %v1249_v15  ;;  %873 = vmatprep.subr.bf16.mxu1 %v1268_v28  ;;  %v595_v15 = vadd.s32 %v1586_v48, %v1615_v3 }
  0x54   : > { %vm611_vm7 = vcmp.lt.s32.totalorder %v595_v15, 500 }
  0x55   : > { %1130 = vmatpush3.bf16.msra.mxu0 %v1250_v18  ;;  %874 = vmatpush1.bf16.msra.mxu1 %v1270_v29 }
  0x56   : > { %1131 = vmatprep.subr.bf16.mxu0 %v1251_v19  ;;  %875 = vmatprep.subr.bf16.mxu1 %v1271_v30 }
  0x59   : > { %1132 = vmatpush3.bf16.msra.mxu0 %v1252_v22  ;;  %876 = vmatpush1.bf16.msra.mxu1 %v1273_v31 }
  0x5a   : > { %877 = vmatprep.subr.bf16.mxu1 %v1274_v32 }
  0x5c   : > { %492 = vmatmul.mubr.bf16.vlgmr.msra.gmra.mrb[0].mxu0 %v1253_v16 }
  0x5d   : > { %499 = vmatprep.mubr.bf16.mxu0 %v1256_v17  ;;  %878 = vmatpush1.bf16.msra.mxu1 %v1276_v33  ;;  %v598_v17 = vadd.s32 %v1586_v48, %v1618_v5 }
  0x5f   : > { %vm614_vm8 = vcmp.lt.s32.totalorder %v598_v17, 500 }
  0x64   : > { %500 = vmatmul.mubr.bf16.gmra.mrb[4].mxu0 %v1258_v20 }
  0x65   : > { %507 = vmatprep.mubr.bf16.mxu0 %v1259_v21 }
  0x6c   : > { %508 = vmatmul.mubr.bf16.gmra.mrb[8].mxu0 %v1261_v23 }
  0x6d   : > { %515 = vmatprep.mubr.bf16.mxu0 %v1262_v24  ;;  %v599_v24 = vadd.s32 %v1586_v48, %v1626_v10 }
  0x6f   : > { %vm615_vm9 = vcmp.lt.s32.totalorder %v599_v24, 500 }
  0x74   : > { %516 = vmatmul.mubr.bf16.gmra.mrb[12].mxu0 %v1264_v25 }
  0x75   : > { %523 = vmatprep.mubr.bf16.mxu0 %v1265_v26 }
  0x7c   : > { %524 = vmatmul.mubr.bf16.gmra.mrb[16].mxu0 %v1267_v27 }
  0x7d   : > { %531 = vmatprep.mubr.bf16.mxu0 %v1268_v28 }
  0x84   : > { %532 = vmatmul.mubr.bf16.gmra.mrb[20].mxu0 %v1270_v29  ;;  %v1654_v29 = vadd.s32 64, %v1581_v45 }
  0x85   : > { %539 = vmatprep.mubr.bf16.mxu0 %v1271_v30 }
  0x8c   : > { %540 = vmatmul.mubr.bf16.gmra.mrb[24].mxu0 %v1273_v31 }
  0x8d   : > { %547 = vmatprep.mubr.bf16.mxu0 %v1274_v32 }
  0x94   : > { %548 = vmatmul.mubr.bf16.gmra.mrb[28].mxu0 %v1276_v33  ;;  %v1660_v33 = vadd.s32 72, %v1581_v45 }
 0x12f   : > { %v1133_v35 = vpop.f32.mrb[0].mxu0 }
 0x130   : > { %v1134_v37 = vpop.f32.mrb[1].mxu0 }
 0x131   : > { %v1135_v38 = vadd.f32 %v1134_v37, %v1133_v35  ;;  %v1136_v39 = vpop.f32.mrb[2].mxu0 }
 0x132   : > { %v1137_v41 = vpop.f32.mrb[3].mxu0 }
 0x133   : > { %v494_v42 = vadd.f32 %v1135_v38, %v1575_v36  ;;  %v1138_v43 = vadd.f32 %v1137_v41, %v1136_v39  ;;  %v600_v41 = vadd.s32 %v1586_v48, %v1654_v29 }
 0x135   : > { %557 = vst.msk [vmem:[%s1504_s7] sm:$0xff] %vm1971_vm1, %v494_v42  ;;  %v497_v44 = vadd.f32 %v1138_v43, %v1575_v36  ;;  %v1620_v6 = vsel %vm608_vm2, %v494_v42, -inf  ;;  %vm616_vm10 = vcmp.lt.s32.totalorder %v600_v41, 500 }
 0x136   : > { %v640_v14 = vsel %vm1971_vm1, %v1620_v6, -inf }
 0x137   : > { %558 = vst.msk [vmem:[%s1504_s7 + $0x8] sm:$0xff] %vm1971_vm1, %v497_v44  ;;  %v1139_v46 = vpop.f32.mrb[4].mxu0  ;;  %v1628_v11 = vsel %vm609_vm3, %v497_v44, -inf }
 0x138   : > { %v1140_v47 = vpop.f32.mrb[5].mxu0  ;;  %v641_v21 = vsel %vm1971_vm1, %v1628_v11, -inf }
 0x139   : > { %v1141_v49 = vadd.f32 %v1140_v47, %v1139_v46  ;;  %v1142_v50 = vpop.f32.mrb[6].mxu0 }
 0x13a   : > { %v1143_v52 = vpop.f32.mrb[7].mxu0 }
 0x13b   : > { %v502_v54 = vadd.f32 %v1141_v49, %v1575_v36  ;;  %v1144_v55 = vadd.f32 %v1143_v52, %v1142_v50  ;;  %v601_v50 = vadd.s32 %v1586_v48, %v1660_v33 }
 0x13d   : > { %559 = vst.msk [vmem:[%s1504_s7 + $0x10] sm:$0xff] %vm1971_vm1, %v502_v54  ;;  %v505_v58 = vadd.f32 %v1144_v55, %v1575_v36  ;;  %v1656_v30 = vsel %vm610_vm6, %v502_v54, -inf  ;;  %vm617_vm11 = vcmp.lt.s32.totalorder %v601_v50, 500 }
 0x13e   : > { %v642_v39 = vsel %vm1971_vm1, %v1656_v30, -inf }
 0x13f   : > { %560 = vst.msk [vmem:[%s1504_s7 + $0x18] sm:$0xff] %vm1971_vm1, %v505_v58  ;;  %v1145_v61 = vpop.f32.mrb[8].mxu0  ;;  %v1662_v35 = vsel %vm611_vm7, %v505_v58, -inf  ;;  %v1686_v58 = vadd.s32 80, %v1581_v45 }
 0x140   : > { %v1146_v63 = vpop.f32.mrb[9].mxu0  ;;  %v643_v46 = vsel %vm1971_vm1, %v1662_v35, -inf }
 0x141   : > { %v1147_v1 = vadd.f32 %v1146_v63, %v1145_v61  ;;  %v1148_v2 = vpop.f32.mrb[10].mxu0  ;;  %v1690_v61 = vadd.s32 88, %v1581_v45 }
 0x142   : > { %v1149_v4 = vpop.f32.mrb[11].mxu0 }
 0x143   : > { %v510_v7 = vadd.f32 %v1147_v1, %v1575_v36  ;;  %v1150_v8 = vadd.f32 %v1149_v4, %v1148_v2  ;;  %v602_v2 = vadd.s32 %v1586_v48, %v1686_v58 }
 0x145   : > { %561 = vst.msk [vmem:[%s1504_s7 + $0x20] sm:$0xff] %vm1971_vm1, %v510_v7  ;;  %v1632_v12 = vsel %vm612_vm4, %v510_v7, -inf  ;;  %v513_v13 = vadd.f32 %v1150_v8, %v1575_v36  ;;  %vm618_vm12 = vcmp.lt.s32.totalorder %v602_v2, 500 }
 0x146   : > { %v644_v16 = vsel %vm1971_vm1, %v1632_v12, -inf }
 0x147   : > { %v645_v18 = vmax.f32 %v640_v14, %v644_v16  ;;  %562 = vst.msk [vmem:[%s1504_s7 + $0x28] sm:$0xff] %vm1971_vm1, %v513_v13  ;;  %v1645_v19 = vsel %vm613_vm5, %v513_v13, -inf  ;;  %v1151_v20 = vpop.f32.mrb[12].mxu0  ;;  %v603_v14 = vadd.s32 %v1586_v48, %v1690_v61 }
 0x148   : > { %v646_v22 = vsel %vm1971_vm1, %v1645_v19, -inf  ;;  %v1152_v23 = vpop.f32.mrb[13].mxu0 }
 0x149   : > { %v647_v25 = vmax.f32 %v641_v21, %v646_v22  ;;  %v1153_v26 = vadd.f32 %v1152_v23, %v1151_v20  ;;  %v1154_v27 = vpop.f32.mrb[14].mxu0  ;;  %vm619_vm13 = vcmp.lt.s32.totalorder %v603_v14, 500  ;;  %v1714_v23 = vadd.s32 104, %v1581_v45 }
 0x14a   : > { %v1155_v28 = vpop.f32.mrb[15].mxu0 }
 0x14b   : > { %v518_v31 = vadd.f32 %v1153_v26, %v1575_v36  ;;  %v1156_v32 = vadd.f32 %v1155_v28, %v1154_v27 }
 0x14d   : > { %563 = vst.msk [vmem:[%s1504_s7 + $0x30] sm:$0xff] %vm1971_vm1, %v518_v31  ;;  %v1666_v37 = vsel %vm614_vm8, %v518_v31, -inf  ;;  %v521_v38 = vadd.f32 %v1156_v32, %v1575_v36 }
 0x14e   : > { %v648_v40 = vsel %vm1971_vm1, %v1666_v37, -inf }
 0x14f   : > { %v649_v42 = vmax.f32 %v642_v39, %v648_v40  ;;  %564 = vst.msk [vmem:[%s1504_s7 + $0x38] sm:$0xff] %vm1971_vm1, %v521_v38  ;;  %v1677_v43 = vsel %vm615_vm9, %v521_v38, -inf  ;;  %v1157_v44 = vpop.f32.mrb[16].mxu0  ;;  %v605_v40 = vadd.s32 %v1586_v48, %v1714_v23 }
 0x150   : > { %v650_v47 = vsel %vm1971_vm1, %v1677_v43, -inf  ;;  %v1158_v49 = vpop.f32.mrb[17].mxu0 }
 0x151   : > { %v651_v52 = vmax.f32 %v643_v46, %v650_v47  ;;  %v1159_v54 = vadd.f32 %v1158_v49, %v1157_v44  ;;  %v1160_v55 = vpop.f32.mrb[18].mxu0  ;;  %vm621_vm15 = vcmp.lt.s32.totalorder %v605_v40, 500 }
 0x152   : > { %v1161_v56 = vpop.f32.mrb[19].mxu0 }
 0x153   : > { %v526_v59 = vadd.f32 %v1159_v54, %v1575_v36  ;;  %v1162_v60 = vadd.f32 %v1161_v56, %v1160_v55  ;;  %v1738_v54 = vadd.s32 120, %v1581_v45 }
 0x155   : > { %565 = vst.msk [vmem:[%s1504_s7 + $0x40] sm:$0xff] %vm1971_vm1, %v526_v59  ;;  %v1694_v63 = vsel %vm616_vm10, %v526_v59, -inf  ;;  %v529_v0 = vadd.f32 %v1162_v60, %v1575_v36 }
 0x156   : > { %v652_v1 = vsel %vm1971_vm1, %v1694_v63, -inf }
 0x157   : > { %v653_v4 = vmax.f32 %v645_v18, %v652_v1  ;;  %566 = vst.msk [vmem:[%s1504_s7 + $0x48] sm:$0xff] %vm1971_vm1, %v529_v0  ;;  %v1703_v7 = vsel %vm617_vm11, %v529_v0, -inf  ;;  %v1163_v8 = vpop.f32.mrb[20].mxu0  ;;  %v1710_v18 = vadd.s32 96, %v1581_v45 }
 0x158   : > { %v654_v9 = vsel %vm1971_vm1, %v1703_v7, -inf  ;;  %v1164_v13 = vpop.f32.mrb[21].mxu0 }
 0x159   : > { %v655_v15 = vmax.f32 %v647_v25, %v654_v9  ;;  %v1165_v16 = vadd.f32 %v1164_v13, %v1163_v8  ;;  %v1166_v17 = vpop.f32.mrb[22].mxu0  ;;  %v604_v27 = vadd.s32 %v1586_v48, %v1710_v18  ;;  %v607_v9 = vadd.s32 %v1586_v48, %v1738_v54 }
 0x15a   : > { %v1167_v20 = vpop.f32.mrb[23].mxu0 }
 0x15b   : > { %v534_v21 = vadd.f32 %v1165_v16, %v1575_v36  ;;  %v1168_v22 = vadd.f32 %v1167_v20, %v1166_v17  ;;  %vm620_vm14 = vcmp.lt.s32.totalorder %v604_v27, 500  ;;  %vm623_vm2 = vcmp.lt.s32.totalorder %v607_v9, 500 }
 0x15d   : > { %567 = vst.msk [vmem:[%s1504_s7 + $0x50] sm:$0xff] %vm1971_vm1, %v534_v21  ;;  %v1718_v24 = vsel %vm618_vm12, %v534_v21, -inf  ;;  %v537_v25 = vadd.f32 %v1168_v22, %v1575_v36 }
 0x15e   : > { %v656_v26 = vsel %vm1971_vm1, %v1718_v24, -inf }
 0x15f   : > { %v657_v28 = vmax.f32 %v649_v42, %v656_v26  ;;  %568 = vst.msk [vmem:[%s1504_s7 + $0x58] sm:$0xff] %vm1971_vm1, %v537_v25  ;;  %v1727_v31 = vsel %vm619_vm13, %v537_v25, -inf  ;;  %v1169_v32 = vpop.f32.mrb[24].mxu0  ;;  %v1734_v42 = vadd.s32 112, %v1581_v45 }
 0x160   : > { %v658_v38 = vsel %vm1971_vm1, %v1727_v31, -inf  ;;  %v1170_v39 = vpop.f32.mrb[25].mxu0 }
 0x161   : > { %v659_v41 = vmax.f32 %v651_v52, %v658_v38  ;;  %v1171_v44 = vadd.f32 %v1170_v39, %v1169_v32  ;;  %v1172_v46 = vpop.f32.mrb[26].mxu0  ;;  %v606_v59 = vadd.s32 %v1586_v48, %v1734_v42 }
 0x162   : > { %v1173_v47 = vpop.f32.mrb[27].mxu0 }
 0x163   : > { %v542_v49 = vadd.f32 %v1171_v44, %v1575_v36  ;;  %v1174_v50 = vadd.f32 %v1173_v47, %v1172_v46  ;;  %vm622_vm0 = vcmp.lt.s32.totalorder %v606_v59, 500 }
 0x165   : > { %569 = vst.msk [vmem:[%s1504_s7 + $0x60] sm:$0xff] %vm1971_vm1, %v542_v49  ;;  %v1742_v55 = vsel %vm620_vm14, %v542_v49, -inf  ;;  %v545_v52 = vadd.f32 %v1174_v50, %v1575_v36 }
 0x166   : > { %v660_v56 = vsel %vm1971_vm1, %v1742_v55, -inf }
 0x167   : > { %v661_v60 = vmax.f32 %v653_v4, %v660_v56  ;;  %570 = vst.msk [vmem:[%s1504_s7 + $0x68] sm:$0xff] %vm1971_vm1, %v545_v52  ;;  %v1751_v0 = vsel %vm621_vm15, %v545_v52, -inf  ;;  %v1175_v1 = vpop.f32.mrb[28].mxu0  ;;  %v1829_v56 = vld [vmem:[#allocation2] sm:$0x1] }
 0x168   : > { %v662_v2 = vsel %vm1971_vm1, %v1751_v0, -inf  ;;  %v1176_v8 = vpop.f32.mrb[29].mxu0 }
 0x169   : > { %v663_v13 = vmax.f32 %v655_v15, %v662_v2  ;;  %v1177_v14 = vadd.f32 %v1176_v8, %v1175_v1  ;;  %v1178_v16 = vpop.f32.mrb[30].mxu0 }
 0x16a   : > { %v1179_v17 = vpop.f32.mrb[31].mxu0 }
 0x16b   : > { %v668_v4 = vmax.f32 %v661_v60, %v663_v13  ;;  %v550_v20 = vadd.f32 %v1177_v14, %v1575_v36  ;;  %v1180_v21 = vadd.f32 %v1179_v17, %v1178_v16 }
 0x16d   : > { %571 = vst.msk [vmem:[%s1504_s7 + $0x70] sm:$0xff] %vm1971_vm1, %v550_v20  ;;  %v638_v22 = vsel %vm622_vm0, %v550_v20, -inf  ;;  %v553_v25 = vadd.f32 %v1180_v21, %v1575_v36 }
 0x16e   : > { %v664_v26 = vsel %vm1971_vm1, %v638_v22, -inf }
 0x16f   : > { %v665_v27 = vmax.f32 %v657_v28, %v664_v26  ;;  %572 = vst.msk [vmem:[%s1504_s7 + $0x78] sm:$0xff] %vm1971_vm1, %v553_v25  ;;  %v639_v48 = vsel %vm623_vm2, %v553_v25, -inf  ;;  %s1382_s7 = smov [#allocation6]  }
 0x170   : > { %v666_v15 = vsel %vm1971_vm1, %v639_v48, -inf  ;;  %s973_s10 = sshll.u32 %s1382_s7, 4  ;;  %s974_s10 = int_to_ptr.vmem [resolvable:$true] %s973_s10 }
 0x171   : > { %v667_v32 = vmax.f32 %v659_v41, %v666_v15  ;;  %s1307_s30 = scalar_lea.vmem %s974_s10, 128  ;;  %p1314_p10 = scmp.lt.s32.totalorder %s974_s10, %s974_s10 }
 0x172   : > { %p1308_p4 = scmp.ne.s32.totalorder %s974_s10, %s1307_s30  ;;  %p1315_p12 = scmp.lt.s32.totalorder %s1307_s30, %s1307_s30 }
 0x173   : > { %v669_v38 = vmax.f32 %v665_v27, %v667_v32 }
 0x174   : > { %p1309_p5 = pnand %p1308_p4, %p1192_p7  ;;  %p1316_p0 = por %p1315_p12, %p1314_p10 }
 0x175   : > { %v670_v39 = vmax.f32 %v668_v4, %v669_v38 }
 0x176   : > { %p1310_p6 = pneg %p1309_p5 }
 0x177   : > { %v671_v40 = vrot.slane %v670_v39, 4 }
 0x178   : > { %p1317_p1 = pnand %p1316_p0, %p1310_p6 }
 0x179   : > { %v672_v44 = vmax.f32 %v670_v39, %v671_v40 }
 0x17b   : > { %v673_v46 = vrot.slane %v672_v44, 2 }
 0x17d   : > { %v674_v47 = vmax.f32 %v672_v44, %v673_v46 }
 0x17f   : > { %v675_v49 = vrot.slane %v674_v47, 1 }
 0x181   : > { %v1765_v50 = vmax.f32 %v674_v47, %v675_v49 }
 0x183   : > { %vm677_vm4 = vcmp.eq.f32.partialorder %v1620_v6, %v1765_v50  ;;  %vm678_vm5 = vcmp.eq.f32.partialorder %v1628_v11, %v1765_v50  ;;  %vm679_vm6 = vcmp.eq.f32.partialorder %v1656_v30, %v1765_v50  ;;  %vm680_vm7 = vcmp.eq.f32.partialorder %v1662_v35, %v1765_v50 }
 0x184   : > { %vm681_vm8 = vcmp.eq.f32.partialorder %v1632_v12, %v1765_v50  ;;  %vm682_vm9 = vcmp.eq.f32.partialorder %v1645_v19, %v1765_v50  ;;  %vm683_vm10 = vcmp.eq.f32.partialorder %v1666_v37, %v1765_v50  ;;  %vm684_vm11 = vcmp.eq.f32.partialorder %v1677_v43, %v1765_v50 }
 0x185   : > { %vm685_vm12 = vcmp.eq.f32.partialorder %v1694_v63, %v1765_v50  ;;  %vm686_vm13 = vcmp.eq.f32.partialorder %v1703_v7, %v1765_v50  ;;  %vm687_vm14 = vcmp.eq.f32.partialorder %v1718_v24, %v1765_v50  ;;  %vm688_vm15 = vcmp.eq.f32.partialorder %v1727_v31, %v1765_v50 }
 0x186   : > { %vm689_vm0 = vcmp.eq.f32.partialorder %v1742_v55, %v1765_v50  ;;  %vm690_vm2 = vcmp.eq.f32.partialorder %v1751_v0, %v1765_v50  ;;  %vm691_vm3 = vcmp.eq.f32.partialorder %v638_v22, %v1765_v50  ;;  %vm692_vm1 = vcmp.eq.f32.partialorder %v639_v48, %v1765_v50 }
 0x187   : > { %v693_v36 = vsel %vm677_vm4, %v1581_v45, 128  ;;  %v694_v28 = vsel %vm678_vm5, %v1589_v51, 128  ;;  %v695_v41 = vsel %vm679_vm6, %v1610_v62, 128  ;;  %v696_v52 = vsel %vm680_vm7, %v1615_v3, 128 }
 0x188   : > { %v697_v6 = vsel %vm681_vm8, %v1592_v53, 128  ;;  %v698_v11 = vsel %vm682_vm9, %v1598_v57, 128  ;;  %v699_v30 = vsel %vm683_vm10, %v1618_v5, 128  ;;  %v700_v35 = vsel %vm684_vm11, %v1626_v10, 128 }
 0x189   : > { %v701_v12 = vsel %vm685_vm12, %v1654_v29, 128  ;;  %v702_v19 = vsel %vm686_vm13, %v1660_v33, 128  ;;  %v703_v37 = vsel %vm687_vm14, %v1686_v58, 128  ;;  %v704_v43 = vsel %vm688_vm15, %v1690_v61, 128 }
 0x18a   : > { %v705_v63 = vsel %vm689_vm0, %v1710_v18, 128  ;;  %v706_v7 = vsel %vm690_vm2, %v1714_v23, 128  ;;  %v707_v24 = vsel %vm691_vm3, %v1734_v42, 128  ;;  %v708_v59 = vsel %vm692_vm1, %v1738_v54, 128 }
 0x18b   : > { %vm1975_vm4 = vcmask 31744   ;;  %vm765_vm7 = vcmp.gt.f32.partialorder %v1765_v50, %v1829_v56  ;;  %vm1983_vm13 = vcmask 24576  }
 0x18c   : > { %v709_v31 = vsel %vm1975_vm4, %v693_v36, 2147483647  ;;  %vm1976_vm5 = vmmov %vm1975_vm4  ;;  %v766_v8 = vsel %vm765_vm7, %v1765_v50, %v1829_v56  ;;  %v1379_v36 = vmov 1.0   ;;  %v1380_v50 = vmov 0.0  }
 0x18d   : > { %v710_v60 = vsel %vm1976_vm5, %v694_v28, 2147483647  ;;  %vm1977_vm6 = vmmov %vm1975_vm4  ;;  %768 = vst.msk [vmem:[#allocation2] sm:$0x1] %vm1983_vm13, %v766_v8  ;;  %v904_v28 = vsel %vm765_vm7, 0.0, %v1379_v36 }
 0x18e   : > { %v711_v55 = vsel %vm1977_vm6, %v695_v41, 2147483647  ;;  %vm1978_vm8 = vmmov %vm1975_vm4  ;;  %905 = vxpose.xlu1.b32.start.end [1/1] (short) (narrow) %v904_v28, 8 }
 0x18f   : > { %v712_v0 = vsel %vm1978_vm8, %v696_v52, 2147483647  ;;  %vm1979_vm9 = vmmov %vm1975_vm4 }
 0x190   : > { %v713_v1 = vsel %vm1979_vm9, %v697_v6, 2147483647  ;;  %vm1980_vm10 = vmmov %vm1975_vm4 }
 0x191   : > { %v716_v2 = vsel %vm1980_vm10, %v698_v11, 2147483647  ;;  %vm714_vm1 = vcmp.lt.s32.totalorder %v709_v31, %v713_v1  ;;  %vm1981_vm11 = vmmov %vm1975_vm4 }
 0x192   : > { %vm717_vm3 = vcmp.lt.s32.totalorder %v710_v60, %v716_v2  ;;  %v719_v9 = vsel %vm1981_vm11, %v699_v30, 2147483647  ;;  %vm1982_vm12 = vmmov %vm1975_vm4  ;;  %v715_v14 = vsel %vm714_vm1, %v709_v31, %v713_v1 }
 0x193   : > { %v722_v13 = vsel %vm1982_vm12, %v700_v35, 2147483647  ;;  %v718_v16 = vsel %vm717_vm3, %v710_v60, %v716_v2  ;;  %vm720_vm14 = vcmp.lt.s32.totalorder %v711_v55, %v719_v9  ;;  %vm1984_vm0 = vmmov %vm1975_vm4 }
 0x194   : > { %vm723_vm15 = vcmp.lt.s32.totalorder %v712_v0, %v722_v13  ;;  %v721_v17 = vsel %vm720_vm14, %v711_v55, %v719_v9  ;;  %v725_v20 = vsel %vm1984_vm0, %v701_v12, 2147483647  ;;  %vm1985_vm2 = vmmov %vm1984_vm0  ;;  %v788_v12 = vsub.s32 0, %v1581_v45 }
 0x195   : > { %v724_v4 = vsel %vm723_vm15, %v712_v0, %v722_v13  ;;  %v728_v21 = vsel %vm1985_vm2, %v702_v19, 2147483647  ;;  %vm726_vm4 = vcmp.lt.s32.totalorder %v715_v14, %v725_v20  ;;  %vm1986_vm6 = vmmov %vm1984_vm0  ;;  %v785_v19 = vsel %vm765_vm7, 1, %v1378_v34 }
 0x196   : > { %vm729_vm5 = vcmp.lt.s32.totalorder %v718_v16, %v728_v21  ;;  %v731_v22 = vsel %vm1986_vm6, %v703_v37, 2147483647  ;;  %vm1987_vm8 = vmmov %vm1984_vm0  ;;  %v727_v26 = vsel %vm726_vm4, %v715_v14, %v725_v20  ;;  %v1381_v13 = vmov 839922192  }
 0x197   : > { %v734_v25 = vsel %vm1987_vm8, %v704_v43, 2147483647  ;;  %v730_v27 = vsel %vm729_vm5, %v718_v16, %v728_v21  ;;  %vm732_vm9 = vcmp.lt.s32.totalorder %v721_v17, %v731_v22  ;;  %vm1988_vm1 = vmmov %vm1984_vm0  ;;  %v943_v14 = vunpack.c.l.s4 %v1381_v13  ;;  %v937_v21 = vld [vmem:[#allocation6] sm:$0xff] }
 0x198   : > { %vm735_vm10 = vcmp.lt.s32.totalorder %v724_v4, %v734_v25  ;;  %v733_v48 = vsel %vm732_vm9, %v721_v17, %v731_v22  ;;  %v737_v32 = vsel %vm1988_vm1, %v705_v63, 2147483647  ;;  %vm1989_vm3 = vmmov %vm1984_vm0  ;;  %v789_v63 = vrot.slane %v785_v19, %v788_v12 }
 0x199   : > { %v736_v15 = vsel %vm735_vm10, %v724_v4, %v734_v25  ;;  %v740_v38 = vsel %vm1989_vm3, %v706_v7, 2147483647  ;;  %vm738_vm11 = vcmp.lt.s32.totalorder %v727_v26, %v737_v32  ;;  %vm1990_vm13 = vmmov %vm1984_vm0  ;;  %v944_v16 = vunpack.c.0.s8 %v943_v14 }
 0x19a   : > { %vm741_vm12 = vcmp.lt.s32.totalorder %v730_v27, %v740_v38  ;;  %v743_v39 = vsel %vm1990_vm13, %v707_v24, 2147483647  ;;  %vm1991_vm14 = vmmov %vm1984_vm0  ;;  %v739_v44 = vsel %vm738_vm11, %v727_v26, %v737_v32  ;;  %vm790_vm10 = vcmp.eq.s32.totalorder %v789_v63, 1 }
 0x19b   : > { %v746_v40 = vsel %vm1991_vm14, %v708_v59, 2147483647  ;;  %v742_v46 = vsel %vm741_vm12, %v730_v27, %v740_v38  ;;  %vm744_vm15 = vcmp.lt.s32.totalorder %v733_v48, %v743_v39  ;;  %v947_v17 = vsub.s32 %v944_v16, %v1581_v45 }
 0x19c   : > { %vm747_vm0 = vcmp.lt.s32.totalorder %v736_v15, %v746_v40  ;;  %v745_v47 = vsel %vm744_vm15, %v733_v48, %v743_v39  ;;  %vm749_vm2 = vcmp.lt.s32.totalorder %v739_v44, %v742_v46 }
 0x19d   : > { %v748_v49 = vsel %vm747_vm0, %v736_v15, %v746_v40  ;;  %v750_v41 = vsel %vm749_vm2, %v739_v44, %v742_v46 }
 0x19e   : > { %vm751_vm4 = vcmp.lt.s32.totalorder %v745_v47, %v748_v49 }
 0x19f   : > { %v752_v52 = vsel %vm751_vm4, %v745_v47, %v748_v49 }
 0x1a0   : > { %vm753_vm5 = vcmp.lt.s32.totalorder %v750_v41, %v752_v52 }
 0x1a1   : > { %v754_v6 = vsel %vm753_vm5, %v750_v41, %v752_v52 }
 0x1a2   : > { %v755_v11 = vrot.slane %v754_v6, 4 }
 0x1a4   : > { %vm756_vm6 = vcmp.lt.s32.totalorder %v754_v6, %v755_v11 }
 0x1a5   : > { %v757_v30 = vsel %vm756_vm6, %v754_v6, %v755_v11 }
 0x1a6   : > { %v758_v35 = vrot.slane %v757_v30, 2 }
 0x1a8   : > { %vm759_vm8 = vcmp.lt.s32.totalorder %v757_v30, %v758_v35 }
 0x1a9   : > { %v760_v37 = vsel %vm759_vm8, %v757_v30, %v758_v35 }
 0x1aa   : > { %v761_v43 = vrot.slane %v760_v37, 1 }
 0x1ac   : > { %vm762_vm9 = vcmp.lt.s32.totalorder %v760_v37, %v761_v43  ;;  %1235 = vset.pattern.permute.xlu1 %v1378_v34 }
 0x1ad   : > { %v763_v7 = vsel %vm762_vm9, %v760_v37, %v761_v43 }
 0x1ae   : > { %vm769_vm1 = vcmp.eq.s32.totalorder %v1581_v45, %v763_v7  ;;  %vm770_vm3 = vcmp.eq.s32.totalorder %v1589_v51, %v763_v7  ;;  %vm771_vm11 = vcmp.eq.s32.totalorder %v1610_v62, %v763_v7  ;;  %vm772_vm13 = vcmp.eq.s32.totalorder %v1615_v3, %v763_v7 }
 0x1af   : > { %vm791_vm12 = vmand %vm769_vm1, %vm790_vm10  ;;  %vm773_vm14 = vcmp.eq.s32.totalorder %v1592_v53, %v763_v7  ;;  %vm774_vm7 = vcmp.eq.s32.totalorder %v1598_v57, %v763_v7  ;;  %vm775_vm4 = vcmp.eq.s32.totalorder %v1618_v5, %v763_v7  ;;  %vm776_vm6 = vcmp.eq.s32.totalorder %v1626_v10, %v763_v7 }
 0x1b0   : > { %vm792_vm15 = vmand %vm770_vm3, %vm790_vm10  ;;  %v1095_v56 = vsel %vm791_vm12, 1.0, %v1380_v50  ;;  %vm777_vm9 = vcmp.eq.s32.totalorder %v1654_v29, %v763_v7  ;;  %vm778_vm3 = vcmp.eq.s32.totalorder %v1660_v33, %v763_v7  ;;  %vm779_vm12 = vcmp.eq.s32.totalorder %v1686_v58, %v763_v7 }
 0x1b1   : > { %v1096_v24 = vsel %vm792_vm15, 1.0, %v1380_v50  ;;  %vm793_vm0 = vmand %vm771_vm11, %vm790_vm10  ;;  %vm781_vm15 = vcmp.eq.s32.totalorder %v1710_v18, %v763_v7 }
 0x1b2   : > { %v839_v59 = vpack.c.bf16 %v1096_v24, %v1095_v56  ;;  %vm794_vm2 = vmand %vm772_vm13, %vm790_vm10  ;;  %v1097_v51 = vsel %vm793_vm0, 1.0, %v1380_v50 }
 0x1b3   : > { %v1098_v62 = vsel %vm794_vm2, 1.0, %v1380_v50  ;;  %vm795_vm5 = vmand %vm773_vm14, %vm790_vm10  ;;  %vm780_vm14 = vcmp.eq.s32.totalorder %v1690_v61, %v763_v7  ;;  %vm782_vm2 = vcmp.eq.s32.totalorder %v1714_v23, %v763_v7 }
 0x1b4   : > { %847 = vxpose.xlu0.c.b16.start [1/8] (narrow) %v839_v59, 16  ;;  %v840_v53 = vpack.c.bf16 %v1098_v62, %v1097_v51  ;;  %vm796_vm8 = vmand %vm774_vm7, %vm790_vm10  ;;  %v1099_v3 = vsel %vm795_vm5, 1.0, %v1380_v50  ;;  %vm783_vm5 = vcmp.eq.s32.totalorder %v1734_v42, %v763_v7 }
 0x1b5   : > { %v1100_v31 = vsel %vm796_vm8, 1.0, %v1380_v50  ;;  %vm797_vm1 = vmand %vm775_vm4, %vm790_vm10  ;;  %vm784_vm8 = vcmp.eq.s32.totalorder %v1738_v54, %v763_v7 }
 0x1b6   : > { %v841_v5 = vpack.c.bf16 %v1100_v31, %v1099_v3  ;;  %vm798_vm11 = vmand %vm776_vm6, %vm790_vm10  ;;  %v1101_v60 = vsel %vm797_vm1, 1.0, %v1380_v50 }
 0x1b7   : > { %v1102_v10 = vsel %vm798_vm11, 1.0, %v1380_v50  ;;  %vm799_vm13 = vmand %vm777_vm9, %vm790_vm10 }
 0x1b8   : > { %848 = vxpose.xlu0.c.b16.cont [2/8] (narrow) %v840_v53, 16  ;;  %v842_v57 = vpack.c.bf16 %v1102_v10, %v1101_v60  ;;  %vm800_vm7 = vmand %vm778_vm3, %vm790_vm10  ;;  %v1103_v29 = vsel %vm799_vm13, 1.0, %v1380_v50 }
 0x1b9   : > { %v1104_v55 = vsel %vm800_vm7, 1.0, %v1380_v50  ;;  %vm801_vm0 = vmand %vm779_vm12, %vm790_vm10 }
 0x1ba   : > { %v843_v33 = vpack.c.bf16 %v1104_v55, %v1103_v29  ;;  %vm802_vm4 = vmand %vm780_vm14, %vm790_vm10  ;;  %v1105_v58 = vsel %vm801_vm0, 1.0, %v1380_v50 }
 0x1bb   : > { %v1106_v0 = vsel %vm802_vm4, 1.0, %v1380_v50  ;;  %vm803_vm6 = vmand %vm781_vm15, %vm790_vm10 }
 0x1bc   : > { %849 = vxpose.xlu0.c.b16.cont [3/8] (narrow) %v841_v5, 16  ;;  %v844_v61 = vpack.c.bf16 %v1106_v0, %v1105_v58  ;;  %vm804_vm9 = vmand %vm782_vm2, %vm790_vm10  ;;  %v1107_v18 = vsel %vm803_vm6, 1.0, %v1380_v50 }
 0x1bd   : > { %v1108_v1 = vsel %vm804_vm9, 1.0, %v1380_v50  ;;  %vm805_vm1 = vmand %vm783_vm5, %vm790_vm10 }
 0x1be   : > { %v845_v23 = vpack.c.bf16 %v1108_v1, %v1107_v18  ;;  %vm806_vm3 = vmand %vm784_vm8, %vm790_vm10  ;;  %v1109_v2 = vsel %vm805_vm1, 1.0, %v1380_v50 }
 0x1bf   : > { %v1110_v42 = vsel %vm806_vm3, 1.0, %v1380_v50 }
 0x1c0   : > { %850 = vxpose.xlu0.c.b16.cont [4/8] (narrow) %v842_v57, 16  ;;  %v846_v8 = vpack.c.bf16 %v1110_v42, %v1109_v2 }
 0x1c4   : > { %851 = vxpose.xlu0.c.b16.cont [5/8] (narrow) %v843_v33, 16 }
 0x1c8   : > { %852 = vxpose.xlu0.c.b16.cont [6/8] (narrow) %v844_v61, 16 }
 0x1cc   : > { %853 = vxpose.xlu0.c.b16.cont [7/8] (narrow) %v845_v23, 16 }
 0x1d0   : > { %854 = vxpose.xlu0.c.b16.end [8/8] (narrow) %v846_v8, 16 }
 0x1d9   : > { %1236 = vset.pattern.permute.xlu0 %v1378_v34 }
 0x20e   : > { %v921_v9 = vpop.trf.xlu1 }
 0x20f   : > { %940 = vperm.xlu1 %1235, %v921_v9  }
 0x21a   : > { %v855_v54 = vpop.trf.xlu0 }
 0x21b   : > { %896 = vmatmul.mubr.bf16.vlgmr.msra.gmra.mrb[0].mxu1 %v855_v54 }
 0x28e   : > { %v941_v4 = vpop.permute.xlu1 %940 }
 0x28f   : > { %v948_v20 = vrot.slane %v941_v4, %v947_v17 }
 0x291   : > { %v950_v22 = vmul.f32 %v948_v20, %v937_v21 }
 0x2ee   : > { %v897_v25 = vpop.f32.mrb[0].mxu1 }
 0x2ef   : > { %v899_v26 = vpop.f32.mrb[1].mxu1 }
 0x2f0   : > { %v953_v34 = vcombine.low %v897_v25, %v899_v26  ;;  %v901_v27 = vpop.f32.mrb[2].mxu1 }
 0x2f1   : > { %v902_v48 = vpop.f32.mrb[3].mxu1 }
 0x2f2   : > { %v955_v15 = vadd.f32 %v953_v34, %v950_v22 }
 0x2f4   : > { %956 = vst [vmem:[#allocation6] sm:$0xff] %v955_v15 }
 0x2f5   : > { %1320 = shalt.err (!%p1317_p1)
}
 0x2f6   : > { %s1321_s24 = scalar_lea.hbm %s1970_s4, 128 }
 0x2f7   : > { %p1322_p2 = scmp.ne.s32.totalorder %s1970_s4, %s1321_s24  ;;  %p1327_p3 = scmp.lt.u32.totalorder %s1321_s24, %s1970_s4 }
 0x2f9   : > { %p1323_p11 = pnand %p1322_p2, %p1192_p7 }
 0x2fb   : > { %p1324_p13 = pneg %p1323_p11 }
 0x2fd   : > { %p1329_p9 = pnand %p1327_p3, %p1324_p13 }
 0x2ff   : > { %1332 = shalt.err (!%p1329_p9)
}
 0x300   : > { %1184 = dma.vmem_to_hbm [thread:$0]  (%p1192_p7), %s974_s10, 128, %s1970_s4, [#allocation5]  }
 0x301   : > { %1354 = dma.done.wait (%p1192_p7), [#allocation5], 128  }
 0x302   : > { %1356 = vsyncadd (%p1192_p7), [#allocation5], 4294967168 }
 0x303 PF: > { %p16_p8 = scmp.ge.s32.totalorder %s1430_s20, 6   ;;  %s1992_s15 = smov %s1363_s16 }
 0x304   : > { %s1993_s16 = smov %s1367_s17  ;;  %s1994_s17 = smov %s1440_s23 }
 0x305   : > { %s1995_s18 = smov %s1430_s20  ;;  %18 = sbr.rel (!%p16_p8) target bundleno = 4 (0x4), region = 85 }
 0x30c   :  { %994 = vsyncpa [#allocation4], 1 }
 0x30d   :  { %996 = vsyncpa [#allocation4 + $0x1], 1 }
 0x30e   :  { %997 = vsyncpa [#allocation5], 1 }
 0x30f   :  { %999 = vsyncpa [#allocation5 + $0x1], 1 }

</bundles_post_ra>
